<compile_context>
chip_gen: v5e
topology: v5e:2x2
jax: 0.10.0
libtpu: 0.0.40
codegen_flags: <defaults>
</compile_context>

<pallas_src>
import functools

import jax
import jax.numpy as jnp
from jax.experimental import pallas as pl
from jax.experimental.pallas import tpu as pltpu


# ---------------------------------------------------------------------------
# Kernel 1: fused QKV projection (one MXU matmul, one fused output slab)
# ---------------------------------------------------------------------------
def _qkv_proj_kernel(x_ref, w_ref, qkv_ref, *, d, compute_dtype):
    x = x_ref[...].astype(compute_dtype)                        # [tm, D]   bf16 operand
    w = w_ref[...]                                               # [D, 3D]   bf16 operand (resident)
    qkv = jnp.dot(x, w, preferred_element_type=jnp.float32)     # [tm, 3D]  f32 accumulate
    # q | k | v are contiguous column chunks of the fused result (the stride-3
    # de-interleave + 1/sqrt(D) scale already happened in the weight prep outside
    # the kernel). Chunks are tile-aligned whenever D % 128 == 0, and all three
    # stores land in the single fused output pipeline.
    qkv_ref[0] = qkv[:, :d].astype(qkv_ref.dtype)                # q (pre-scaled)
    qkv_ref[1] = qkv[:, d:2 * d].astype(qkv_ref.dtype)           # k
    qkv_ref[2] = qkv[:, 2 * d:].astype(qkv_ref.dtype)            # v


# ---------------------------------------------------------------------------
# Kernel 2: flash-style attention (online softmax over KV tiles)
# ---------------------------------------------------------------------------
def _flash_attn_kernel(q_ref, k_ref, v_ref, o_ref, m_sc, l_sc, acc_sc):
    kv = pl.program_id(2)

    @pl.when(kv == 0)
    def _():
        m_sc[...] = jnp.full_like(m_sc, -jnp.inf)
        l_sc[...] = jnp.zeros_like(l_sc)
        acc_sc[...] = jnp.zeros_like(acc_sc)

    q = q_ref[0, 0]                                              # [tq,  D]  (pre-scaled)
    k = k_ref[0, 0]                                              # [tkv, D]
    v = v_ref[0, 0]                                              # [tkv, D]

    # scores = q @ k^T expressed as a direct contraction -> no k.T materialization.
    s = jax.lax.dot_general(
        q, k, dimension_numbers=(((1,), (1,)), ((), ())),
        preferred_element_type=jnp.float32)                      # [tq, tkv] f32

    # TODO(synk): optional boolean `mask` (masked_fill with -inf) not wired in;
    # the reference default path (mask=None) is implemented.

    m_prev = m_sc[...]
    m_new = jnp.maximum(m_prev, jnp.max(s, axis=-1, keepdims=True))
    alpha = jnp.exp(m_prev - m_new)                              # f32 softmax math
    p = jnp.exp(s - m_new)
    l_sc[...] = alpha * l_sc[...] + jnp.sum(p, axis=-1, keepdims=True)
    acc_sc[...] = alpha * acc_sc[...] + jnp.dot(
        p.astype(v.dtype), v, preferred_element_type=jnp.float32)
    m_sc[...] = m_new

    @pl.when(kv == pl.num_programs(2) - 1)
    def _():
        # Exact divide: runs once per q tile, negligible cost, tight f32 parity.
        inv_l = pl.reciprocal(l_sc[...], approx=False)
        o_ref[0] = (acc_sc[...] * inv_l).astype(o_ref.dtype)


# ---------------------------------------------------------------------------
# Wrapper
# ---------------------------------------------------------------------------
def _pick_seq_tile(n, target):
    """Largest tile <= target that divides n, preferring lane/sublane-friendly
    sizes: multiples of 128 first (native lane tiles), then 16 (bf16 sublane
    pack), then 8.  Falls back to the full extent (always a legal block)."""
    if n <= target:
        return n
    for step in (128, 16, 8):
        best = None
        t = step
        while t <= target:
            if n % t == 0:
                best = t
            t += step
        if best is not None:
            return best
    return n


def _vmem_limit_bytes():
    """~64 MiB scoped budget on 128-MiB parts (v5e/v6e), ~48 MiB on 64-MiB
    parts (v7x, where megacore replicates resident buffers per core)."""
    try:
        cap = pltpu.get_tpu_info().vmem_capacity_bytes
    except Exception:
        cap = 64 * 1024 * 1024
    return 48 * 1024 * 1024 if cap <= 64 * 1024 * 1024 else 64 * 1024 * 1024


def self_attention(x, w_qkv, *, compute_dtype=jnp.bfloat16,
                   tm_target=512, tq_target=512, tkv_target=512):
    """x: [B, T, D] float32;  w_qkv: [3*D, D] (PyTorch nn.Linear weight)."""
    B, T, D = x.shape
    assert w_qkv.shape == (3 * D, D)
    scale = float(D) ** (-0.5)
    vmem_limit = _vmem_limit_bytes()

    # ---- one-time parameter glue (outside any kernel) ----------------------
    # rearrange 'b t (d k) -> k b t d' (k=3) selects the stride-3 output
    # columns, i.e. stride-3 row slices of W.  Pre-transpose, fold the
    # 1/sqrt(D) scale into the q columns, fuse into one [D, 3D] MXU operand.
    wq = w_qkv[0::3, :] * scale
    wk = w_qkv[1::3, :]
    wv = w_qkv[2::3, :]
    w_fused_t = jnp.concatenate([wq.T, wk.T, wv.T], axis=1).astype(compute_dtype)

    # ---- kernel 1: fused QKV projection, batch folded into M ---------------
    M = B * T
    x2 = x.reshape(M, D)
    tm = _pick_seq_tile(M, tm_target)
    proj_kernel = functools.partial(
        _qkv_proj_kernel, d=D, compute_dtype=compute_dtype)
    # TODO(synk): for very large D (>= ~2K) on v7x, add a column-panel grid axis
    # so the [D, 3D] weight streams in panels instead of staying fully resident.
    qkv3 = pl.pallas_call(
        proj_kernel,
        out_shape=jax.ShapeDtypeStruct((3, M, D), compute_dtype),
        grid_spec=pltpu.PrefetchScalarGridSpec(
            num_scalar_prefetch=0,
            grid=(M // tm,),
            in_specs=[
                pl.BlockSpec((tm, D), lambda m: (m, 0)),        # x rows, tiled over M
                # Constant index_map -> weight stays resident across the grid;
                # single-buffered since double-buffering a never-changing block
                # only doubles its VMEM footprint.
                pl.BlockSpec((D, 3 * D), lambda m: (0, 0),
                             pipeline_mode=pl.Buffered(1)),
            ],
            out_specs=pl.BlockSpec((3, tm, D), lambda m: (0, m, 0)),
        ),
        compiler_params=pltpu.CompilerParams(
            dimension_semantics=("parallel",),
            vmem_limit_bytes=vmem_limit),
    )(x2, w_fused_t)

    qkv3 = qkv3.reshape(3, B, T, D)      # contiguous split of M -> metadata only

    # ---- kernel 2: tiled flash attention -----------------------------------
    tq = _pick_seq_tile(T, tq_target)      # bigger tq => fewer K/V HBM re-reads
    tkv = _pick_seq_tile(T, tkv_target)
    # TODO(synk): for D <= ~256, sweep pipeline_mode=pl.Buffered(3) on the K/V
    # specs (short per-step MXU time can expose K/V DMA latency).

    return pl.pallas_call(
        _flash_attn_kernel,
        out_shape=jax.ShapeDtypeStruct((B, T, D), x.dtype),
        grid_spec=pltpu.PrefetchScalarGridSpec(
            num_scalar_prefetch=0,
            grid=(B, T // tq, T // tkv),
            in_specs=[
                # q / k / v are leading-axis selections of the fused projection
                # output: same HBM array passed three times, no wrapper-side
                # slicing copies, legal block shapes for any D.
                pl.BlockSpec((1, 1, tq, D), lambda b, qi, ki: (0, b, qi, 0)),
                pl.BlockSpec((1, 1, tkv, D), lambda b, qi, ki: (1, b, ki, 0)),
                pl.BlockSpec((1, 1, tkv, D), lambda b, qi, ki: (2, b, ki, 0)),
            ],
            out_specs=pl.BlockSpec((1, tq, D), lambda b, qi, ki: (b, qi, 0)),
            scratch_shapes=[
                pltpu.VMEM((tq, 1), jnp.float32),   # running row max
                pltpu.VMEM((tq, 1), jnp.float32),   # running softmax denom
                pltpu.VMEM((tq, D), jnp.float32),   # f32 output accumulator
            ],
        ),
        compiler_params=pltpu.CompilerParams(
            # Batch and query-tile axes are parallel (feeds both v7x cores);
            # the KV axis is the online-softmax reduction -> "arbitrary".
            dimension_semantics=("parallel", "parallel", "arbitrary"),
            vmem_limit_bytes=vmem_limit),
    )(qkv3, qkv3, qkv3)


def xavier_normal(key, shape):
    # nn.init.xavier_normal_ for a [fan_out, fan_in] Linear weight.
    fan_out, fan_in = shape
    std = (2.0 / (fan_in + fan_out)) ** 0.5
    return std * jax.random.normal(key, shape, dtype=jnp.float32)


if __name__ == "__main__":
    B, T, D = 2, 8, 32

    key = jax.random.PRNGKey(0)
    kx, kw = jax.random.split(key)
    x = jax.random.normal(kx, (B, T, D), dtype=jnp.float32)
    w_qkv = xavier_normal(kw, (3 * D, D))             # nn.Linear(D, 3D, bias=False)

    out = self_attention(x, w_qkv)
    jax.block_until_ready(out)

    # pure-JAX f32 reference (tolerance loosened for bf16 MXU operands / weights).
    qkv = x @ w_qkv.T
    q, k, v = qkv[..., 0::3], qkv[..., 1::3], qkv[..., 2::3]
    s = jnp.einsum("bid,bjd->bij", q, k) * (D ** -0.5)
    ref = jnp.einsum("bij,bjd->bid", jax.nn.softmax(s, axis=-1), v)
    err = float(jnp.max(jnp.abs(out - ref)))
    assert jnp.allclose(out, ref, atol=3e-2, rtol=3e-2), err

    print("KERNEL_OK")
</pallas_src>

<mosaic_0001>
module attributes {stable_mosaic.version = 11 : i64} {
  func.func @_qkv_proj_kernel(%arg0: i32, %arg1: memref<16x32xf32, #tpu.memory_space<vmem>>, %arg2: memref<32x96xbf16, #tpu.memory_space<vmem>>, %arg3: memref<3x16x32xbf16, #tpu.memory_space<vmem>>) attributes {dimension_semantics = [#tpu.dimension_semantics<parallel>], iteration_bounds = array<i64: 1>, scalar_prefetch = 0 : i64, scratch_operands = 0 : i64, tpu.core_type = #tpu.core_type<tc>, window_params = [{transform_indices = @transform_0, window_bounds = array<i64: 16, 32>}, {pipeline_mode = #tpu.pipeline_mode<synchronous>, transform_indices = @transform_1, window_bounds = array<i64: 32, 96>}, {transform_indices = @transform_2, window_bounds = array<i64: 3, 16, 32>}]} {
    %c0 = arith.constant 0 : index
    %c0_0 = arith.constant 0 : index
    %0 = vector.load %arg1[%c0, %c0_0] : memref<16x32xf32, #tpu.memory_space<vmem>>, vector<16x32xf32>
    %1 = arith.truncf %0 : vector<16x32xf32> to vector<16x32xbf16>
    %c0_1 = arith.constant 0 : index
    %c0_2 = arith.constant 0 : index
    %2 = vector.load %arg2[%c0_1, %c0_2] : memref<32x96xbf16, #tpu.memory_space<vmem>>, vector<32x96xbf16>
    %cst = arith.constant dense<0.000000e+00> : vector<16x96xf32>
    %3 = tpu.matmul %1, %2, %cst {dimension_numbers = #tpu.dot_dimension_numbers<[1], [0], [0], [1], [0, 0, 1, 1], [], []>} : vector<16x32xbf16>, vector<32x96xbf16>, vector<16x96xf32> -> vector<16x96xf32>
    %4 = vector.extract_strided_slice %3 {offsets = [0, 0], sizes = [16, 32], strides = [1, 1]} : vector<16x96xf32> to vector<16x32xf32>
    %5 = arith.truncf %4 : vector<16x32xf32> to vector<16x32xbf16>
    %c0_3 = arith.constant 0 : index
    %c0_4 = arith.constant 0 : index
    %c0_5 = arith.constant 0 : index
    %6 = vector.load %arg3[%c0_3, %c0_4, %c0_5] : memref<3x16x32xbf16, #tpu.memory_space<vmem>>, vector<1x16x32xbf16>
    %7 = vector.shape_cast %6 : vector<1x16x32xbf16> to vector<16x32xbf16>
    %8 = vector.shape_cast %5 : vector<16x32xbf16> to vector<1x16x32xbf16>
    tpu.vector_store %arg3[%c0_3, %c0_4, %c0_5], %8 {strides = array<i32>} : memref<3x16x32xbf16, #tpu.memory_space<vmem>>, vector<1x16x32xbf16>,
    %9 = vector.extract_strided_slice %3 {offsets = [0, 32], sizes = [16, 32], strides = [1, 1]} : vector<16x96xf32> to vector<16x32xf32>
    %10 = arith.truncf %9 : vector<16x32xf32> to vector<16x32xbf16>
    %c1 = arith.constant 1 : index
    %c0_6 = arith.constant 0 : index
    %c0_7 = arith.constant 0 : index
    %11 = vector.load %arg3[%c1, %c0_6, %c0_7] : memref<3x16x32xbf16, #tpu.memory_space<vmem>>, vector<1x16x32xbf16>
    %12 = vector.shape_cast %11 : vector<1x16x32xbf16> to vector<16x32xbf16>
    %13 = vector.shape_cast %10 : vector<16x32xbf16> to vector<1x16x32xbf16>
    tpu.vector_store %arg3[%c1, %c0_6, %c0_7], %13 {strides = array<i32>} : memref<3x16x32xbf16, #tpu.memory_space<vmem>>, vector<1x16x32xbf16>,
    %14 = vector.extract_strided_slice %3 {offsets = [0, 64], sizes = [16, 32], strides = [1, 1]} : vector<16x96xf32> to vector<16x32xf32>
    %15 = arith.truncf %14 : vector<16x32xf32> to vector<16x32xbf16>
    %c2 = arith.constant 2 : index
    %c0_8 = arith.constant 0 : index
    %c0_9 = arith.constant 0 : index
    %16 = vector.load %arg3[%c2, %c0_8, %c0_9] : memref<3x16x32xbf16, #tpu.memory_space<vmem>>, vector<1x16x32xbf16>
    %17 = vector.shape_cast %16 : vector<1x16x32xbf16> to vector<16x32xbf16>
    %18 = vector.shape_cast %15 : vector<16x32xbf16> to vector<1x16x32xbf16>
    tpu.vector_store %arg3[%c2, %c0_8, %c0_9], %18 {strides = array<i32>} : memref<3x16x32xbf16, #tpu.memory_space<vmem>>, vector<1x16x32xbf16>,
    return
  }
  func.func @transform_0(%arg0: i32) -> (i32, i32) {
    %c0_i32 = arith.constant 0 : i32
    %c0_i32_0 = arith.constant 0 : i32
    return %arg0, %c0_i32 : i32, i32
  }
  func.func @transform_1(%arg0: i32) -> (i32, i32) {
    %c0_i32 = arith.constant 0 : i32
    %c0_i32_0 = arith.constant 0 : i32
    %c0_i32_1 = arith.constant 0 : i32
    return %c0_i32, %c0_i32_0 : i32, i32
  }
  func.func @transform_2(%arg0: i32) -> (i32, i32, i32) {
    %c0_i32 = arith.constant 0 : i32
    %c0_i32_0 = arith.constant 0 : i32
    %c0_i32_1 = arith.constant 0 : i32
    return %c0_i32, %arg0, %c0_i32_0 : i32, i32, i32
  }
}

</mosaic_0001>

<bundles_post_ra>
// kernel: tpu_custom_call.1
= control target key start
LH: loop header
LB: loop body
LE: loop exit
PB: predicated region body
PF: predicated region fallthrough
CT: control target
= control target key end

     0   :  { %7 = vsyncpa [#allocation3], 0  ;;  %s270_s0 = inlined_call_operand.hbm [shape: f32[16,32], index: 0, kind: input, shape index: {}]   ;;  %s271_s1 = inlined_call_operand.hbm [shape: bf16[32,96], index: 1, kind: input, shape index: {}]   ;;  %s272_s2 = inlined_call_operand.hbm [shape: bf16[3,16,32], index: 2, kind: output, shape index: {}]  }
   0x1   :  { %8 = vsyncpa [#allocation6], 0 }
   0x2   :  { %9 = vsyncpa [#allocation4], 0  ;;  %s14_s11 = sshll.u32 %s270_s0, 4  ;;  %s224_s12 = smov [#allocation2]   ;;  %s15_s11 = int_to_ptr.hbm [resolvable:$true] %s14_s11 }
   0x3   :  { %s16_s13 = sshll.u32 %s224_s12, 4  ;;  %s27_s16 = sshll.u32 %s271_s1, 4  ;;  %s17_s13 = int_to_ptr.vmem [resolvable:$true] %s16_s13  ;;  %s28_s16 = int_to_ptr.hbm [resolvable:$true] %s27_s16 }
   0x4   :  { %s225_s17 = smov 128   ;;  %s226_s18 = smov 8  }
   0x5   :  { %22 = dma.hbm_to_vmem [thread:$0]  %s15_s11, 256, %s17_s13, [#allocation3], %s225_s17, %s225_s17, %s226_s18  }
   0x6   :  { %s227_s19 = smov [#allocation5]   ;;  %s228_s21 = smov 64  }
   0x7   :  { %s29_s20 = sshll.u32 %s227_s19, 4  ;;  %s229_s22 = smov 4   ;;  %s30_s20 = int_to_ptr.vmem [resolvable:$true] %s29_s20 }
   0x8   :  { %35 = dma.hbm_to_vmem [thread:$0]  %s28_s16, 256, %s30_s20, [#allocation6], %s228_s21, %s228_s21, %s229_s22  }
   0x9   :  { %218 = dma.done.wait [#allocation3], 256  }
   0xa   :  { %219 = vsyncadd [#allocation3], 4294967040 }
   0xb   :  { %220 = dma.done.wait [#allocation6], 256  }
   0xc   :  { %221 = vsyncadd [#allocation6], 4294967040  ;;  %v137_v0 = vld [vmem:[#allocation5 + $0x8] sm:$0xff]  ;;  %v136_v1 = vld [vmem:[#allocation5] sm:$0xff]  ;;  %vm64_vm0 = vcmask 261120   ;;  %vm84_vm1 = vcmask 257024  }
   0xd   :  { %74 = vmatpush.bf16.msra.mxu0 %v137_v0  ;;  %v45_v2 = vld [vmem:[#allocation2] sm:$0xff]  ;;  %v46_v3 = vld [vmem:[#allocation2 + $0x8] sm:$0xff]  ;;  %s230_s0 = smov 96   ;;  %s231_s1 = smov [#allocation7]  }
   0xe   :  { %v47_v4 = vpack.c.bf16 %v46_v3, %v45_v2  ;;  %s111_s23 = sshll.u32 %s231_s1, 4  ;;  %s113_s26 = sshll.u32 %s272_s2, 4  ;;  %s112_s23 = int_to_ptr.vmem [resolvable:$true] %s111_s23  ;;  %s114_s26 = int_to_ptr.hbm [resolvable:$true] %s113_s26 }
  0x11   :  { %75 = vmatpush.bf16.msra.mxu0 %v136_v1 }
  0x14   :  { %135 = vmatmul.msk.bf16.vlgmr.msra.gmra.mxu0 %vm64_vm0, %v47_v4 }
  0x91   :  { %v77_v5 = vpop.f32.mrf.mxu0 }
  0x92   :  { %v82_v6 = vpack.c.bf16 %v77_v5, %v77_v5 }
  0x94   :  { %85 = vst.msk [vmem:[#allocation7] sm:$0xf] %vm84_vm1, %v82_v6  ;;  %98 = vrot.lane.b32.xlu1 %v82_v6, %s228_s21  ;;  %89 = vrot.lane.b32.xlu0 %v82_v6, %s230_s0 }
  0x99   :  { %v79_v7 = vpop.f32.mrf.mxu0 }
  0x9a   :  { %v83_v8 = vpack.c.bf16 %v79_v7, %v79_v7 }
  0x9c   :  { %86 = vst.msk [vmem:[#allocation7 + $0x4] sm:$0xf] %vm84_vm1, %v83_v8  ;;  %100 = vrot.lane.b32.xlu1 %v83_v8, %s228_s21  ;;  %91 = vrot.lane.b32.xlu0 %v83_v8, %s230_s0 }
 0x106   :  { %v99_v9 = vpop.permute.xlu1 %98  ;;  %v90_v10 = vpop.permute.xlu0 %89 }
 0x107   :  { %105 = vst.msk [vmem:[#allocation7 + $0x10] sm:$0xf] %vm84_vm1, %v99_v9 }
 0x108   :  { %96 = vst.msk [vmem:[#allocation7 + $0x8] sm:$0xf] %vm84_vm1, %v90_v10 }
 0x10e   :  { %v101_v11 = vpop.permute.xlu1 %100  ;;  %v92_v12 = vpop.permute.xlu0 %91 }
 0x10f   :  { %106 = vst.msk [vmem:[#allocation7 + $0x14] sm:$0xf] %vm84_vm1, %v101_v11 }
 0x110   :  { %97 = vst.msk [vmem:[#allocation7 + $0xc] sm:$0xf] %vm84_vm1, %v92_v12 }
 0x111   :  { %119 = dma.vmem_to_hbm [thread:$0]  %s112_s23, 384, %s114_s26, [#allocation4], %s228_s21, %s228_s21, %s229_s22  }
 0x112   :  { %222 = dma.done.wait [#allocation4], 384  }
 0x113   :  { %223 = vsyncadd [#allocation4], 4294966912 }
 0x114   :  { %124 = vsyncpa [#allocation3], 1 }
 0x115   :  { %125 = vsyncpa [#allocation6], 1 }
 0x116   :  { %126 = vsyncpa [#allocation4], 1 }

</bundles_post_ra>
